<compile_context>
chip_gen: v7x
topology: tpu7x:2x2x1
jax: 0.10.0
libtpu: 0.0.40
codegen_flags: <defaults>
</compile_context>

<pallas_src>
import functools

import jax
import jax.numpy as jnp
from jax.experimental import pallas as pl
from jax.experimental.pallas import tpu as pltpu

LANE = 128
DEFAULT_BLOCK_ROWS = 8192                 # 8192 x 128 f32 = 4 MiB per block
TILED_VMEM_LIMIT = 48 * 1024 * 1024       # < v7x's 64 MiB physical, with headroom


def _vmem_capacity_bytes():
    """Generation-aware VMEM size; falls back to the smallest (v7x, 64 MiB)."""
    try:
        info = pltpu.get_tpu_info()
        cap = getattr(info, "vmem_capacity_bytes", None)
        if cap:
            return int(cap)
    except Exception:
        pass
    return 64 * 1024 * 1024


def _round_half_away(q):
    """Round.forward: round half away from zero (floor/ceil form, no sign/abs/mul)."""
    return jnp.where(q >= 0.0, jnp.floor(q + 0.5), jnp.ceil(q - 0.5))


def _scale_params(x_min, x_max, Qn, Qp):
    """alpha, 1/alpha, zero_point from (1,1) min/max tiles.

    Kept in 1-element-vector domain so the divide and round-to-nearest-even
    lower as ordinary vector ops; reduced back to f32 scalars at the end
    (scalar operands of later vector ops are splatted for free).
    """
    alpha = (x_max - x_min) / float(Qp - Qn)
    zp = jnp.round(float(Qp) - x_max / alpha)      # torch.round == half-to-even
    return jnp.max(alpha), jnp.max(1.0 / alpha), jnp.max(zp)


# ------------------------- Pallas kernels -------------------------

def _fused_resident_kernel(x_ref, o_ref, *, Qn, Qp):
    """Whole activation resident in VMEM: min/max + scale + fake-quant in one pass."""
    x = x_ref[...].astype(jnp.float32)
    x_min = jnp.min(x, keepdims=True)              # (1, 1)
    x_max = jnp.max(x, keepdims=True)
    alpha, inv_alpha, zp = _scale_params(x_min, x_max, Qn, Qp)
    q = x * inv_alpha + zp
    q = jnp.clip(q, float(Qn), float(Qp))
    q = _round_half_away(q)
    o_ref[...] = ((q - zp) * alpha).astype(o_ref.dtype)


def _minmax_scale_kernel(x_ref, alpha_ref, inv_alpha_ref, zp_ref,
                         vmin_ref, vmax_ref, *, Qn, Qp, valid_rows, need_mask):
    """Pass 1 (tiled): global min/max + alpha / 1/alpha / zero_point.

    Each grid step folds its (block_rows, 128) tile into an (8, 128) running
    min/max held in VMEM scratch (elementwise VPU work only).  The ragged-block
    mask is built only on the last step; the cross-lane reduce, the scale math
    and the SMEM scalar stores also happen exactly once, on the last step.
    """
    i = pl.program_id(0)
    last = pl.num_programs(0) - 1
    block_rows = x_ref.shape[0]
    x = x_ref[...].astype(jnp.float32)

    @pl.when(i == 0)
    def _():
        vmin_ref[...] = jnp.full((8, LANE), jnp.inf, jnp.float32)
        vmax_ref[...] = jnp.full((8, LANE), -jnp.inf, jnp.float32)

    def merge(x_for_min, x_for_max):
        # Fold to one (8,128) tile: reduction over the leading axis is an
        # elementwise min/max across vregs (VPU), not an XLU cross-lane reduce.
        vmin_ref[...] = jnp.minimum(
            vmin_ref[...], x_for_min.reshape(-1, 8, LANE).min(axis=0))
        vmax_ref[...] = jnp.maximum(
            vmax_ref[...], x_for_max.reshape(-1, 8, LANE).max(axis=0))

    if need_mask:
        @pl.when(i != last)
        def _():
            merge(x, x)

        @pl.when(i == last)
        def _():
            row = jax.lax.broadcasted_iota(jnp.int32, (block_rows, LANE), 0)
            valid = (i * block_rows + row) < valid_rows
            merge(jnp.where(valid, x, jnp.inf), jnp.where(valid, x, -jnp.inf))
    else:
        merge(x, x)

    @pl.when(i == last)
    def _():
        x_min = jnp.min(vmin_ref[...], keepdims=True)     # (1, 1)
        x_max = jnp.max(vmax_ref[...], keepdims=True)
        alpha, inv_alpha, zp = _scale_params(x_min, x_max, Qn, Qp)
        alpha_ref[0, 0] = alpha
        inv_alpha_ref[0, 0] = inv_alpha
        zp_ref[0, 0] = zp


def _quant_kernel(alpha_ref, inv_alpha_ref, zp_ref, x_ref, o_ref, *, Qn, Qp):
    """Pass 2 (tiled): elementwise fake quantization; scalars read from SMEM."""
    alpha = alpha_ref[0, 0]
    inv_alpha = inv_alpha_ref[0, 0]
    zp = zp_ref[0, 0]
    x = x_ref[...].astype(jnp.float32)
    q = x * inv_alpha + zp
    q = jnp.clip(q, float(Qn), float(Qp))
    q = _round_half_away(q)
    o_ref[...] = ((q - zp) * alpha).astype(o_ref.dtype)


# --------------------------- wrapper -------------------------------

def qat_activation_quantizer(activation, a_bits=8, all_positive=False, *,
                             block_rows=None, force_tiled=False):
    """Forward pass of QATActivationQuantizer."""
    if a_bits == 32:
        return activation
    assert a_bits != 1, "Binary quantization is not supported"

    if all_positive:
        Qn, Qp = 0, 2 ** a_bits - 1
    else:
        Qn, Qp = -(2 ** (a_bits - 1)), 2 ** (a_bits - 1) - 1

    orig_shape = activation.shape
    orig_dtype = activation.dtype

    flat = activation.reshape(-1)          # original dtype end-to-end
    n = flat.shape[0]

    # Lane padding only when unavoidable.  mode='edge' replicates a real element
    # so min/max stay exact and no in-kernel lane mask is required.
    n_pad = (-n) % LANE
    if n_pad:
        flat = jnp.pad(flat, (0, n_pad), mode="edge")
    rows = flat.shape[0] // LANE
    x2d = flat.reshape(rows, LANE)

    vmem_bytes = _vmem_capacity_bytes()
    f32_working_bytes = rows * LANE * 4    # in-kernel f32 working copy

    if not force_tiled and f32_working_bytes <= vmem_bytes // 10:
        # ---- fast path: one fused call, x resident in VMEM (2N HBM bytes) ----
        q2d = pl.pallas_call(
            functools.partial(_fused_resident_kernel, Qn=Qn, Qp=Qp),
            out_shape=jax.ShapeDtypeStruct((rows, LANE), orig_dtype),
            compiler_params=pltpu.CompilerParams(
                vmem_limit_bytes=int(vmem_bytes * 0.75)),
        )(x2d)
    else:
        # ---- large path: tiled two-pass (3N HBM bytes) ------------------------
        br = DEFAULT_BLOCK_ROWS if block_rows is None else block_rows
        br = max(8, br - br % 8)           # sublane-aligned block rows
        grid = (pl.cdiv(rows, br),)
        need_mask = grid[0] * br != rows   # only the last block can be ragged

        block_spec = pl.BlockSpec((br, LANE), lambda i: (i, 0))
        smem_scalar = pl.BlockSpec(memory_space=pltpu.MemorySpace.SMEM)

        alpha, inv_alpha, zp = pl.pallas_call(
            functools.partial(_minmax_scale_kernel, Qn=Qn, Qp=Qp,
                              valid_rows=rows, need_mask=need_mask),
            out_shape=(
                jax.ShapeDtypeStruct((1, 1), jnp.float32),
                jax.ShapeDtypeStruct((1, 1), jnp.float32),
                jax.ShapeDtypeStruct((1, 1), jnp.float32),
            ),
            grid=grid,
            in_specs=[block_spec],
            out_specs=(smem_scalar, smem_scalar, smem_scalar),
            scratch_shapes=[
                pltpu.VMEM((8, LANE), jnp.float32),
                pltpu.VMEM((8, LANE), jnp.float32),
            ],
            compiler_params=pltpu.CompilerParams(
                dimension_semantics=("arbitrary",),
                vmem_limit_bytes=TILED_VMEM_LIMIT),
        )(x2d)

        q2d = pl.pallas_call(
            functools.partial(_quant_kernel, Qn=Qn, Qp=Qp),
            out_shape=jax.ShapeDtypeStruct((rows, LANE), orig_dtype),
            grid=grid,
            in_specs=[smem_scalar, smem_scalar, smem_scalar, block_spec],
            out_specs=block_spec,
            compiler_params=pltpu.CompilerParams(
                dimension_semantics=("parallel",),
                vmem_limit_bytes=TILED_VMEM_LIMIT),
        )(alpha, inv_alpha, zp, x2d)

    out = q2d.reshape(-1)
    if n_pad:
        out = out[:n]
    return out.reshape(orig_shape)


# ------------------------- reference (pure JAX) ---------------------

def _reference(x, a_bits=8, all_positive=False):
    if all_positive:
        Qn, Qp = 0, 2 ** a_bits - 1
    else:
        Qn, Qp = -(2 ** (a_bits - 1)), 2 ** (a_bits - 1) - 1
    xf = x.astype(jnp.float32)
    x_max = xf.max()
    x_min = xf.min()
    alpha = (x_max - x_min) / float(Qp - Qn)
    zp = jnp.round(Qp - x_max / alpha)
    # x * (1/alpha) matches the kernel bit-for-bit; equals torch's x/alpha to 1 ulp.
    q = jnp.clip(xf * (1.0 / alpha) + zp, Qn, Qp)
    q = jnp.sign(q) * jnp.floor(jnp.abs(q) + 0.5)
    return ((q - zp) * alpha).astype(x.dtype)


if __name__ == "__main__":
    key = jax.random.PRNGKey(0)
    k1, k2 = jax.random.split(key)

    # Small NCHW activation (batch=2, channels=4, spatial=16): fused resident path.
    x = jax.random.normal(k1, (2, 4, 16, 16), dtype=jnp.float32) * 3.0
    out = jax.block_until_ready(qat_activation_quantizer(x, a_bits=8))
    ref = _reference(x, a_bits=8)
    assert out.shape == x.shape and out.dtype == x.dtype
    assert jnp.allclose(out, ref, atol=1e-5, rtol=1e-5)

    # Exercise the tiled two-pass path (including a ragged last block) on a small
    # input by forcing tiny blocks.
    x2 = jax.random.normal(k2, (2, 4, 12, 16), dtype=jnp.float32) * 2.0 + 0.5
    out2 = jax.block_until_ready(
        qat_activation_quantizer(x2, a_bits=8, force_tiled=True, block_rows=8))
    ref2 = _reference(x2, a_bits=8)
    assert out2.shape == x2.shape and out2.dtype == x2.dtype
    assert jnp.allclose(out2, ref2, atol=1e-5, rtol=1e-5)

    print("KERNEL_OK")
</pallas_src>

<mosaic_0001>
module attributes {stable_mosaic.version = 11 : i64} {
  func.func @_fused_resident_kernel(%arg0: memref<16x128xf32, #tpu.memory_space<vmem>>, %arg1: memref<16x128xf32, #tpu.memory_space<vmem>>) attributes {dimension_semantics = [], scalar_prefetch = 0 : i64, scratch_operands = 0 : i64, tpu.core_type = #tpu.core_type<tc>} {
    %c0 = arith.constant 0 : index
    %c0_0 = arith.constant 0 : index
    %0 = vector.load %arg0[%c0, %c0_0] : memref<16x128xf32, #tpu.memory_space<vmem>>, vector<16x128xf32>
    %1 = vector.shape_cast %0 : vector<16x128xf32> to vector<1x16x128xf32>
    %cst = arith.constant dense<0x7F800000> : vector<1xf32>
    %2 = vector.multi_reduction <minimumf>, %1, %cst [1, 2] : vector<1x16x128xf32> to vector<1xf32>
    %3 = vector.shape_cast %2 : vector<1xf32> to vector<1x1x1xf32>
    %4 = vector.extract %3[0, 0, 0] : f32 from vector<1x1x1xf32>
    %5 = vector.broadcast %4 : f32 to vector<1x1xf32>
    %6 = vector.shape_cast %0 : vector<16x128xf32> to vector<1x16x128xf32>
    %cst_1 = arith.constant dense<0xFF800000> : vector<1xf32>
    %7 = vector.multi_reduction <maximumf>, %6, %cst_1 [1, 2] : vector<1x16x128xf32> to vector<1xf32>
    %8 = vector.shape_cast %7 : vector<1xf32> to vector<1x1x1xf32>
    %9 = vector.extract %8[0, 0, 0] : f32 from vector<1x1x1xf32>
    %10 = vector.broadcast %9 : f32 to vector<1x1xf32>
    %11 = arith.subf %10, %5 : vector<1x1xf32>
    %cst_2 = arith.constant 2.550000e+02 : f32
    %12 = vector.broadcast %cst_2 : f32 to vector<1x1xf32>
    %13 = arith.divf %11, %12 : vector<1x1xf32>
    %14 = arith.divf %10, %13 : vector<1x1xf32>
    %cst_3 = arith.constant 1.270000e+02 : f32
    %15 = vector.broadcast %cst_3 : f32 to vector<1x1xf32>
    %16 = arith.subf %15, %14 : vector<1x1xf32>
    %17 = math.roundeven %16 : vector<1x1xf32>
    %18 = vector.shape_cast %13 : vector<1x1xf32> to vector<1x1x1xf32>
    %cst_4 = arith.constant dense<0xFF800000> : vector<1xf32>
    %19 = vector.multi_reduction <maximumf>, %18, %cst_4 [1, 2] : vector<1x1x1xf32> to vector<1xf32>
    %20 = vector.shape_cast %19 : vector<1xf32> to vector<1x1x1xf32>
    %21 = vector.extract %20[0, 0, 0] : f32 from vector<1x1x1xf32>
    %cst_5 = arith.constant 1.000000e+00 : f32
    %22 = vector.broadcast %cst_5 : f32 to vector<1x1xf32>
    %23 = arith.divf %22, %13 : vector<1x1xf32>
    %24 = vector.shape_cast %23 : vector<1x1xf32> to vector<1x1x1xf32>
    %cst_6 = arith.constant dense<0xFF800000> : vector<1xf32>
    %25 = vector.multi_reduction <maximumf>, %24, %cst_6 [1, 2] : vector<1x1x1xf32> to vector<1xf32>
    %26 = vector.shape_cast %25 : vector<1xf32> to vector<1x1x1xf32>
    %27 = vector.extract %26[0, 0, 0] : f32 from vector<1x1x1xf32>
    %28 = vector.shape_cast %17 : vector<1x1xf32> to vector<1x1x1xf32>
    %cst_7 = arith.constant dense<0xFF800000> : vector<1xf32>
    %29 = vector.multi_reduction <maximumf>, %28, %cst_7 [1, 2] : vector<1x1x1xf32> to vector<1xf32>
    %30 = vector.shape_cast %29 : vector<1xf32> to vector<1x1x1xf32>
    %31 = vector.extract %30[0, 0, 0] : f32 from vector<1x1x1xf32>
    %32 = vector.broadcast %27 : f32 to vector<16x128xf32>
    %33 = arith.mulf %0, %32 : vector<16x128xf32>
    %34 = vector.broadcast %31 : f32 to vector<16x128xf32>
    %35 = arith.addf %33, %34 : vector<16x128xf32>
    %cst_8 = arith.constant -1.280000e+02 : f32
    %cst_9 = arith.constant 1.270000e+02 : f32
    %36 = vector.broadcast %cst_8 : f32 to vector<16x128xf32>
    %37 = arith.maximumf %36, %35 : vector<16x128xf32>
    %38 = vector.broadcast %cst_9 : f32 to vector<16x128xf32>
    %39 = arith.minimumf %38, %37 : vector<16x128xf32>
    %cst_10 = arith.constant 0.000000e+00 : f32
    %40 = vector.broadcast %cst_10 : f32 to vector<16x128xf32>
    %41 = arith.cmpf oge, %39, %40 : vector<16x128xf32>
    %cst_11 = arith.constant 5.000000e-01 : f32
    %42 = vector.broadcast %cst_11 : f32 to vector<16x128xf32>
    %43 = arith.addf %39, %42 : vector<16x128xf32>
    %44 = math.floor %43 : vector<16x128xf32>
    %cst_12 = arith.constant 5.000000e-01 : f32
    %45 = vector.broadcast %cst_12 : f32 to vector<16x128xf32>
    %46 = arith.subf %39, %45 : vector<16x128xf32>
    %47 = math.ceil %46 : vector<16x128xf32>
    %48 = arith.select %41, %44, %47 : vector<16x128xi1>, vector<16x128xf32>
    %49 = vector.broadcast %31 : f32 to vector<16x128xf32>
    %50 = arith.subf %48, %49 : vector<16x128xf32>
    %51 = vector.broadcast %21 : f32 to vector<16x128xf32>
    %52 = arith.mulf %50, %51 : vector<16x128xf32>
    %c0_13 = arith.constant 0 : index
    %c0_14 = arith.constant 0 : index
    %53 = vector.load %arg1[%c0_13, %c0_14] : memref<16x128xf32, #tpu.memory_space<vmem>>, vector<16x128xf32>
    tpu.vector_store %arg1[%c0_13, %c0_14], %52 {strides = array<i32>} : memref<16x128xf32, #tpu.memory_space<vmem>>, vector<16x128xf32>,
    return
  }
}

</mosaic_0001>

<bundles_post_ra>
// kernel: tpu_custom_call.1
= control target key start
LH: loop header
LB: loop body
LE: loop exit
PB: predicated region body
PF: predicated region fallthrough
CT: control target
= control target key end

     0   :  { %6 = vsyncpa [#allocation3], 0  ;;  %s218_s0 = inlined_call_operand.hbm [shape: f32[16,128], index: 0, kind: input, shape index: {}]   ;;  %s219_s1 = inlined_call_operand.hbm [shape: f32[16,128], index: 1, kind: output, shape index: {}]  }
   0x1   :  { %7 = vsyncpa [#allocation4], 0  ;;  %s171_s6 = smov [#allocation2]   ;;  %s123_s10 = scalar_lea.hbm %s218_s0, 256 }
   0x2   :  { %s13_s7 = sshll.u32 %s171_s6, 4  ;;  %p124_p0 = scmp.ne.s32.totalorder %s218_s0, %s123_s10  ;;  %s14_s7 = int_to_ptr.vmem [resolvable:$true] %s13_s7 }
   0x3   :  { %p127_p1 = scmp.lt.u32.totalorder %s123_s10, %s218_s0 }
   0x5   :  { %p129_p2 = pnand %p127_p1, %p124_p0 }
   0x7   :  { %132 = shalt.err (!%p129_p2)
}
   0x8   :  { %s133_s15 = scalar_lea.vmem %s14_s7, 256  ;;  %p138_p4 = scmp.lt.s32.totalorder %s14_s7, %s14_s7 }
   0x9   :  { %p134_p3 = scmp.ne.s32.totalorder %s14_s7, %s133_s15  ;;  %p139_p5 = scmp.lt.s32.totalorder %s133_s15, %s133_s15 }
   0xb   :  { %p140_p6 = por %p139_p5, %p138_p4 }
   0xd   :  { %p141_p7 = pnand %p140_p6, %p134_p3 }
   0xf   :  { %144 = shalt.err (!%p141_p7)
}
  0x10   :  { %s172_s16 = smov 128   ;;  %s173_s17 = smov 8  }
  0x11   :  { %19 = dma.hbm_to_vmem [thread:$0]  %s218_s0, 256, %s14_s7, [#allocation3], %s172_s16, %s172_s16, %s173_s17  }
  0x12   :  { %167 = dma.done.wait [#allocation3], 256  }
  0x13   :  { %168 = vsyncadd [#allocation3], 4294967040  ;;  %v23_v0 = vld [vmem:[#allocation2] sm:$0xff]  ;;  %v24_v1 = vld [vmem:[#allocation2 + $0x8] sm:$0xff]  ;;  %s174_s24 = smov [#allocation5]  }
  0x14   :  { %v25_v2 = vmin.f32 %v23_v0, %v24_v1  ;;  %v36_v3 = vmax.f32 %v23_v0, %v24_v1  ;;  %s92_s25 = sshll.u32 %s174_s24, 4  ;;  %s93_s25 = int_to_ptr.vmem [resolvable:$true] %s92_s25 }
  0x15   :  { %s145_s26 = scalar_lea.vmem %s93_s25, 256  ;;  %p150_p9 = scmp.lt.s32.totalorder %s93_s25, %s93_s25 }
  0x16   :  { %26 = vmin.xlane.f32.xlu0 %v25_v2  ;;  %p146_p8 = scmp.ne.s32.totalorder %s93_s25, %s145_s26  ;;  %p151_p10 = scmp.lt.s32.totalorder %s145_s26, %s145_s26 }
  0x18   :  { %p152_p11 = por %p151_p10, %p150_p9 }
  0x1a   :  { %37 = vmax.xlane.f32.xlu0 %v36_v3  ;;  %p153_p12 = pnand %p152_p11, %p146_p8 }
  0xa3   :  { %v27_v4 = vpop.xlane.xlu0 %26 }
  0xa4   :  { %v28_v5 = vrot.slane %v27_v4, 4 }
  0xa6   :  { %v29_v6 = vmin.f32 %v27_v4, %v28_v5 }
  0xa7   :  { %v38_v7 = vpop.xlane.xlu0 %37 }
  0xa8   :  { %v30_v8 = vrot.slane %v29_v6, 2  ;;  %v39_v9 = vrot.slane %v38_v7, 4 }
  0xaa   :  { %v40_v10 = vmax.f32 %v38_v7, %v39_v9  ;;  %v31_v11 = vmin.f32 %v29_v6, %v30_v8 }
  0xac   :  { %v41_v12 = vrot.slane %v40_v10, 2  ;;  %v32_v13 = vrot.slane %v31_v11, 1 }
  0xae   :  { %v42_v14 = vmax.f32 %v40_v10, %v41_v12  ;;  %v33_v15 = vmin.f32 %v31_v11, %v32_v13 }
  0xb0   :  { %106 = vpush %v33_v15  ;;  %v43_v16 = vrot.slane %v42_v14, 1 }
  0xb2   :  { %v44_v17 = vmax.f32 %v42_v14, %v43_v16 }
  0xb4   :  { %108 = vpush %v44_v17 }
  0xe1   :  { %s107_s0 = spop %106 }
  0xe2   :  { %v35_v18 = vstv %s107_s0 }
  0xe5   :  { %s109_s20 = spop %108 }
  0xe6   :  { %v46_v19 = vstv %s109_s20 }
  0xe7   :  { %v47_v20 = vsub.f32 %v46_v19, %v35_v18 }
  0xe9   :  { %v49_v21 = vmul.f32 0.003921569, %v47_v20 }
  0xeb   :  { %121 = vrcp.f32 %v49_v21  ;;  %111 = vpush %v49_v21 }
  0xf5   :  { %v122_v22 = vpop.eup %121 }
  0xf6   :  { %v51_v23 = vmul.f32 %v122_v22, %v46_v19  ;;  %113 = vpush %v122_v22 }
  0xf8   :  { %v52_v24 = vsub.f32 127.0, %v51_v23 }
  0xfa   :  { %v110_v25 = vround.rtne.f32 %v52_v24 }
  0xfc   :  { %115 = vpush %v110_v25 }
 0x11c   :  { %s200_s21 = spop %111 }
 0x11d   :  { %v82_v48 = vstv %s200_s21 }
 0x127   :  { %s114_s22 = spop %113 }
 0x128   :  { %v58_v26 = vstv %s114_s22 }
 0x129   :  { %v59_v27 = vmul.f32 %v58_v26, %v23_v0  ;;  %v60_v28 = vmul.f32 %v58_v26, %v24_v1 }
 0x12d   :  { %s116_s23 = spop %115 }
 0x12e   :  { %v61_v29 = vstv %s116_s23 }
 0x12f   :  { %v62_v30 = vadd.f32 %v61_v29, %v59_v27  ;;  %v63_v31 = vadd.f32 %v61_v29, %v60_v28 }
 0x131   :  { %v64_v32 = vmax.f32 %v62_v30, -128.0  ;;  %v65_v33 = vmax.f32 %v63_v31, -128.0 }
 0x133   :  { %v66_v34 = vmin.f32 %v64_v32, 127.0  ;;  %v67_v35 = vmin.f32 %v65_v33, 127.0 }
 0x135   :  { %v70_v36 = vadd.f32 0.5, %v66_v34  ;;  %v71_v37 = vadd.f32 0.5, %v67_v35  ;;  %v104_v38 = vadd.f32 -0.5, %v66_v34  ;;  %v105_v39 = vadd.f32 -0.5, %v67_v35 }
 0x136   :  { %vm68_vm0 = vcmp.ge.f32.partialorder %v66_v34, 0.0  ;;  %vm69_vm1 = vcmp.ge.f32.partialorder %v67_v35, 0.0 }
 0x137   :  { %v72_v40 = vfloor.f32 %v70_v36  ;;  %v73_v41 = vfloor.f32 %v71_v37  ;;  %v76_v42 = vceil.f32 %v104_v38  ;;  %v77_v43 = vceil.f32 %v105_v39 }
 0x139   :  { %v78_v44 = vsel %vm68_vm0, %v72_v40, %v76_v42  ;;  %v79_v45 = vsel %vm69_vm1, %v73_v41, %v77_v43 }
 0x13a   :  { %v80_v46 = vsub.f32 %v78_v44, %v61_v29  ;;  %v81_v47 = vsub.f32 %v79_v45, %v61_v29 }
 0x13c   :  { %v83_v49 = vmul.f32 %v82_v48, %v80_v46  ;;  %v84_v50 = vmul.f32 %v82_v48, %v81_v47 }
 0x13e   :  { %85 = vst [vmem:[#allocation5] sm:$0xff] %v83_v49  ;;  %86 = vst [vmem:[#allocation5 + $0x8] sm:$0xff] %v84_v50 }
 0x13f   :  { %156 = shalt.err (!%p153_p12)
}
 0x140   :  { %s157_s29 = scalar_lea.hbm %s219_s1, 256 }
 0x141   :  { %p158_p13 = scmp.ne.s32.totalorder %s219_s1, %s157_s29  ;;  %p161_p0 = scmp.lt.u32.totalorder %s157_s29, %s219_s1 }
 0x143   :  { %p163_p1 = pnand %p161_p0, %p158_p13 }
 0x145   :  { %166 = shalt.err (!%p163_p1)
}
 0x146   :  { %98 = dma.vmem_to_hbm [thread:$0]  %s93_s25, 256, %s219_s1, [#allocation4], %s172_s16, %s172_s16, %s173_s17  }
 0x147   :  { %169 = dma.done.wait [#allocation4], 256  }
 0x148   :  { %170 = vsyncadd [#allocation4], 4294967040 }
 0x149   :  { %102 = vsyncpa [#allocation3], 1 }
 0x14a   :  { %103 = vsyncpa [#allocation4], 1 }

</bundles_post_ra>
